<compile_context>
chip_gen: v7x
topology: tpu7x:2x2x1
jax: 0.10.0
libtpu: 0.0.40
codegen_flags: <defaults>
</compile_context>

<pallas_src>
import numpy as np
import jax
import jax.numpy as jnp
from jax.experimental import pallas as pl
from jax.experimental.pallas import tpu as pltpu

SEED = 69
DISEASE_COL = 0

LANES = 128                 # vreg lane width (last dim maps to lanes)
ROW_PAD = 32                # pad rows to x32: int8 tile (32,128), bf16 tile (16,128)
HOST_FALLBACK_N = 4096      # below this, dispatch/H2D/D2H dominate -> numpy path
MAX_SINGLE_BLOCK_ROWS = 8192  # 8192x128 bf16 = 2 MiB in + 1 MiB i8 out per block
BIG_ROW_TILE = 8192         # row tile only for very large N (>~1M labels)


# ----------------------------------------------------------------------------
# Kernel: NaN-label mask (the __init__ filter loop, vectorized on the VPU)
# ----------------------------------------------------------------------------
def nan_mask_kernel(lbl_ref, mask_ref):
    l = lbl_ref[...]
    # Exactly the original loop: select i where labels[i] is NOT one of
    # {1, 0, -1}.  NaN != x for every x, so true NaNs are selected; out-of-set
    # values (e.g. 2.0) are selected too, same as the spec.
    not_valid = jnp.logical_and(jnp.logical_and(l != 1.0, l != 0.0), l != -1.0)
    mask_ref[...] = not_valid.astype(jnp.int8)


def compute_nan_mask(labels_1d, *, force_device=False):
    """labels_1d: host float array [N].  Returns numpy bool [N] mask."""
    labels_np = np.asarray(labels_1d)
    n = int(labels_np.shape[0])

    if n < HOST_FALLBACK_N and not force_device:
        # Tiny N: kernel launch + transfers are pure overhead; downstream
        # np.nonzero / gather are host-side anyway.
        return (labels_np != 1) & (labels_np != 0) & (labels_np != -1)

    rows = -(-n // LANES)
    if rows <= MAX_SINGLE_BLOCK_ROWS:
        tr = -(-rows // ROW_PAD) * ROW_PAD      # single full-array block
    else:
        tr = BIG_ROW_TILE                       # multi-block only for huge N
    R = -(-rows // tr) * tr

    # Host-side pad + bf16 cast + reshape (free vs. an extra device HBM pass).
    # Pad value 0.0 is a "valid" label, so padded slots never set the mask.
    # {1.0, 0.0, -1.0, NaN} are exactly representable in bf16, so the compare
    # chain is exact for the label set of this module.
    lab_flat = np.zeros((R * LANES,), dtype=jnp.bfloat16)
    lab_flat[:n] = labels_np.astype(jnp.bfloat16)
    lab2d = jnp.asarray(lab_flat.reshape(R, LANES))

    mask2d = pl.pallas_call(
        nan_mask_kernel,
        out_shape=jax.ShapeDtypeStruct((R, LANES), jnp.int8),
        grid_spec=pltpu.PrefetchScalarGridSpec(
            num_scalar_prefetch=0,
            grid=(R // tr,),
            in_specs=[pl.BlockSpec((tr, LANES), lambda i: (i, 0))],
            out_specs=pl.BlockSpec((tr, LANES), lambda i: (i, 0)),
        ),
        compiler_params=pltpu.CompilerParams(
            dimension_semantics=("parallel",),
            vmem_limit_bytes=16 * 1024 * 1024,  # well under v7x's 64 MiB physical
        ),
    )(lab2d)

    mask = np.asarray(jax.block_until_ready(mask2d)).reshape(-1)[:n]
    return mask.astype(bool)


# ----------------------------------------------------------------------------
# Module emulation (deterministic synthetic data instead of .npy files)
# ----------------------------------------------------------------------------
class DataModulePallas:
    def __init__(self, phase: str, n_samples=64, hw=16):
        # TODO(synk): the real module np.load()s allTrain_224x224.npy
        # (178157,224,224) and the labels file from disk; deterministic
        # synthetic data is used here instead.
        np.random.seed(SEED)
        imgs = np.random.randint(-128, 127, size=(n_samples, hw, hw)).astype(np.int8)
        lbl_choices = np.array([1.0, 0.0, -1.0, np.nan], dtype=np.float32)
        labels = lbl_choices[np.random.randint(0, 4, size=(n_samples,))]

        # --- label filter (host fallback at tiny N, Pallas kernel otherwise) ---
        mask = compute_nan_mask(labels)
        self.nan_mask = mask
        nan_indices = np.nonzero(mask)[0]
        print(f"There are {len(nan_indices)} NAN labels")
        # gather + expand_dims is host-side glue, same as the original numpy code
        self.inputs = jnp.asarray(
            np.expand_dims(imgs[nan_indices], axis=1).astype(np.int8)
        )
        self._labels_ref = labels  # kept for the self-check in __main__

    def forward(self, dummy):
        # Exact semantics of DataModule.forward: identity.  No kernel is
        # launched — a copy kernel would add a full HBM read+write and
        # dispatch overhead for zero semantic effect on every generation.
        return dummy

    __call__ = forward


# ----------------------------------------------------------------------------
if __name__ == "__main__":
    dm = DataModulePallas(phase="train", n_samples=64, hw=16)

    # Check module behaviour (tiny N -> host fallback path).
    lbl = dm._labels_ref
    ref_mask = (lbl != 1) & (lbl != 0) & (lbl != -1)
    assert np.array_equal(dm.nan_mask, ref_mask)
    assert dm.inputs.ndim == 4 and dm.inputs.shape[1] == 1
    assert dm.inputs.dtype == jnp.int8
    assert dm.inputs.shape[0] == int(ref_mask.sum())

    # Exercise the Pallas kernel itself once on a deterministic label vector
    # (PRNGKey(0)) large enough to be representative: 8192 labels -> 64 rows,
    # already a multiple of 32 -> a single (64,128) bf16 block, grid of 1.
    key = jax.random.PRNGKey(0)
    n_dev = 8192
    idx = jax.random.randint(key, (n_dev,), 0, 4)
    choices = jnp.array([1.0, 0.0, -1.0, jnp.nan], dtype=jnp.float32)
    dev_labels = np.asarray(choices[idx])
    got = compute_nan_mask(dev_labels, force_device=True)   # blocks internally
    want = (dev_labels != 1) & (dev_labels != 0) & (dev_labels != -1)
    assert np.array_equal(got, want)

    # forward(dummy) == dummy, same shape/dtype (identity, zero HBM traffic).
    dummy = jax.random.normal(key, (2, 4, 16, 16), dtype=jnp.float32)
    out = jax.block_until_ready(dm(dummy))
    assert out.shape == dummy.shape and out.dtype == dummy.dtype
    assert bool(jnp.all(out == dummy))

    print("KERNEL_OK")
</pallas_src>

<mosaic_0001>
module attributes {stable_mosaic.version = 11 : i64} {
  func.func @nan_mask_kernel(%arg0: i32, %arg1: memref<64x128xbf16, #tpu.memory_space<vmem>>, %arg2: memref<64x128xi8, #tpu.memory_space<vmem>>) attributes {dimension_semantics = [#tpu.dimension_semantics<parallel>], iteration_bounds = array<i64: 1>, scalar_prefetch = 0 : i64, scratch_operands = 0 : i64, tpu.core_type = #tpu.core_type<tc>, window_params = [{transform_indices = @transform_0, window_bounds = array<i64: 64, 128>}, {transform_indices = @transform_1, window_bounds = array<i64: 64, 128>}]} {
    %c0 = arith.constant 0 : index
    %c0_0 = arith.constant 0 : index
    %0 = vector.load %arg1[%c0, %c0_0] : memref<64x128xbf16, #tpu.memory_space<vmem>>, vector<64x128xbf16>
    %cst = arith.constant 1.000000e+00 : bf16
    %1 = vector.broadcast %cst : bf16 to vector<64x128xbf16>
    %2 = arith.cmpf one, %0, %1 : vector<64x128xbf16>
    %cst_1 = arith.constant 0.000000e+00 : bf16
    %3 = vector.broadcast %cst_1 : bf16 to vector<64x128xbf16>
    %4 = arith.cmpf one, %0, %3 : vector<64x128xbf16>
    %5 = arith.andi %2, %4 : vector<64x128xi1>
    %cst_2 = arith.constant -1.000000e+00 : bf16
    %6 = vector.broadcast %cst_2 : bf16 to vector<64x128xbf16>
    %7 = arith.cmpf one, %0, %6 : vector<64x128xbf16>
    %8 = arith.andi %5, %7 : vector<64x128xi1>
    %9 = arith.extui %8 : vector<64x128xi1> to vector<64x128xi8>
    %c0_3 = arith.constant 0 : index
    %c0_4 = arith.constant 0 : index
    %10 = vector.load %arg2[%c0_3, %c0_4] : memref<64x128xi8, #tpu.memory_space<vmem>>, vector<64x128xi8>
    tpu.vector_store %arg2[%c0_3, %c0_4], %9 {strides = array<i32>} : memref<64x128xi8, #tpu.memory_space<vmem>>, vector<64x128xi8>,
    return
  }
  func.func @transform_0(%arg0: i32) -> (i32, i32) {
    %c0_i32 = arith.constant 0 : i32
    %c0_i32_0 = arith.constant 0 : i32
    return %arg0, %c0_i32 : i32, i32
  }
  func.func @transform_1(%arg0: i32) -> (i32, i32) {
    %c0_i32 = arith.constant 0 : i32
    %c0_i32_0 = arith.constant 0 : i32
    return %arg0, %c0_i32 : i32, i32
  }
}

</mosaic_0001>

<bundles_post_ra>
// kernel: tpu_custom_call.1
= control target key start
LH: loop header
LB: loop body
LE: loop exit
PB: predicated region body
PF: predicated region fallthrough
CT: control target
= control target key end

     0   :  { %6 = vsyncpa [#allocation3], 0  ;;  %s297_s0 = inlined_call_operand.hbm [shape: bf16[64,128], index: 0, kind: input, shape index: {}]   ;;  %s298_s1 = inlined_call_operand.hbm [shape: s8[64,128], index: 1, kind: output, shape index: {}]  }
   0x1   :  { %7 = vsyncpa [#allocation4], 0  ;;  %s202_s6 = smov [#allocation2]   ;;  %s154_s10 = scalar_lea.hbm %s297_s0, 512 }
   0x2   :  { %s13_s7 = sshll.u32 %s202_s6, 4  ;;  %p155_p0 = scmp.ne.s32.totalorder %s297_s0, %s154_s10  ;;  %s14_s7 = int_to_ptr.vmem [resolvable:$true] %s13_s7 }
   0x3   :  { %p158_p1 = scmp.lt.u32.totalorder %s154_s10, %s297_s0 }
   0x5   :  { %p160_p2 = pnand %p158_p1, %p155_p0 }
   0x7   :  { %163 = shalt.err (!%p160_p2)
}
   0x8   :  { %s164_s15 = scalar_lea.vmem %s14_s7, 512  ;;  %p169_p4 = scmp.lt.s32.totalorder %s14_s7, %s14_s7 }
   0x9   :  { %p165_p3 = scmp.ne.s32.totalorder %s14_s7, %s164_s15  ;;  %p170_p5 = scmp.lt.s32.totalorder %s164_s15, %s164_s15 }
   0xb   :  { %p171_p6 = por %p170_p5, %p169_p4 }
   0xd   :  { %p172_p7 = pnand %p171_p6, %p165_p3 }
   0xf   :  { %175 = shalt.err (!%p172_p7)
}
  0x10   :  { %s203_s16 = smov 64   ;;  %s204_s17 = smov 4  }
  0x11   :  { %19 = dma.hbm_to_vmem [thread:$0]  %s297_s0, 512, %s14_s7, [#allocation3], %s203_s16, %s203_s16, %s204_s17  }
  0x12   :  { %198 = dma.done.wait [#allocation3], 512  }
  0x13   :  { %199 = vsyncadd [#allocation3], 4294966784  ;;  %v30_v0 = vld [vmem:[#allocation2] sm:$0xf]  ;;  %v31_v1 = vld [vmem:[#allocation2 + $0x4] sm:$0xf] }
  0x14   :  { %v32_v2 = vld [vmem:[#allocation2 + $0x8] sm:$0xf]  ;;  %v33_v3 = vld [vmem:[#allocation2 + $0xc] sm:$0xf]  ;;  %vm38_vm0 = vcmp.ne.bf16.partialorder %v30_v0, 1065369472 }
  0x15   :  { %vm39_vm1 = vcmp.ne.bf16.partialorder %v31_v1, 1065369472  ;;  %vm40_vm2 = vcmp.ne.bf16.partialorder %v32_v2, 1065369472  ;;  %vm46_vm3 = vcmp.ne.bf16.partialorder %v30_v0, 0  ;;  %vm47_vm4 = vcmp.ne.bf16.partialorder %v31_v1, 0 }
  0x16   :  { %vm41_vm5 = vcmp.ne.bf16.partialorder %v33_v3, 1065369472  ;;  %vm48_vm6 = vcmp.ne.bf16.partialorder %v32_v2, 0  ;;  %vm49_vm7 = vcmp.ne.bf16.partialorder %v33_v3, 0  ;;  %vm54_vm8 = vmand %vm38_vm0, %vm46_vm3  ;;  %vm62_vm10 = vcmp.ne.bf16.partialorder %v30_v0, 3212885888 }
  0x17   :  { %vm55_vm9 = vmand %vm39_vm1, %vm47_vm4  ;;  %vm63_vm12 = vcmp.ne.bf16.partialorder %v31_v1, 3212885888  ;;  %v34_v5 = vld [vmem:[#allocation2 + $0x10] sm:$0xf]  ;;  %v35_v6 = vld [vmem:[#allocation2 + $0x14] sm:$0xf] }
  0x18   :  { %vm231_vm11 = vmand %vm40_vm2, %vm48_vm6  ;;  %vm64_vm14 = vcmp.ne.bf16.partialorder %v32_v2, 3212885888  ;;  %v36_v8 = vld [vmem:[#allocation2 + $0x18] sm:$0xf]  ;;  %vm65_vm15 = vcmp.ne.bf16.partialorder %v33_v3, 3212885888 }
  0x19   :  { %vm235_vm13 = vmand %vm41_vm5, %vm49_vm7  ;;  %v37_v9 = vld [vmem:[#allocation2 + $0x1c] sm:$0xf]  ;;  %v205_v10 = vmov 0   ;;  %vm42_vm1 = vcmp.ne.bf16.partialorder %v34_v5, 1065369472  ;;  %vm50_vm4 = vcmp.ne.bf16.partialorder %v34_v5, 0 }
  0x1a   :  { %vm70_vm0 = vmand %vm54_vm8, %vm62_vm10  ;;  %vm43_vm2 = vcmp.ne.bf16.partialorder %v35_v6, 1065369472  ;;  %vm44_vm5 = vcmp.ne.bf16.partialorder %v36_v8, 1065369472  ;;  %vm51_vm7 = vcmp.ne.bf16.partialorder %v35_v6, 0  ;;  %vm52_vm10 = vcmp.ne.bf16.partialorder %v36_v8, 0 }
  0x1b   :  { %vm71_vm3 = vmand %vm55_vm9, %vm63_vm12  ;;  %v78_v11 = vsel %vm70_vm0, 65537, %v205_v10  ;;  %vm45_vm9 = vcmp.ne.bf16.partialorder %v37_v9, 1065369472  ;;  %vm53_vm0 = vcmp.ne.bf16.partialorder %v37_v9, 0  ;;  %s206_s0 = smov [#allocation5]  }
  0x1c   :  { %vm72_vm6 = vmand %vm231_vm11, %vm64_vm14  ;;  %v79_v12 = vsel %vm71_vm3, 65537, %v205_v10  ;;  %v86_v13 = vpack.c.b8 %v78_v11, %v78_v11  ;;  %s135_s20 = sshll.u32 %s206_s0, 4  ;;  %s136_s20 = int_to_ptr.vmem [resolvable:$true] %s135_s20 }
  0x1d   :  { %vm73_vm8 = vmand %vm235_vm13, %vm65_vm15  ;;  %v80_v14 = vsel %vm72_vm6, 65537, %v205_v10  ;;  %v87_v15 = vpack.c.b8 %v79_v12, %v79_v12  ;;  %vm66_vm15 = vcmp.ne.bf16.partialorder %v34_v5, 3212885888  ;;  %s176_s21 = scalar_lea.vmem %s136_s20, 256  ;;  %p181_p9 = scmp.lt.s32.totalorder %s136_s20, %s136_s20 }
  0x1e   :  { %v81_v16 = vsel %vm73_vm8, 65537, %v205_v10  ;;  %v88_v17 = vpack.c.b8 %v80_v14, %v80_v14  ;;  %vm94_vm12 = vnez %v86_v13  ;;  %vm249_vm11 = vmand %vm42_vm1, %vm50_vm4  ;;  %vm67_vm1 = vcmp.ne.bf16.partialorder %v35_v6, 3212885888  ;;  %p177_p8 = scmp.ne.s32.totalorder %s136_s20, %s176_s21  ;;  %p182_p10 = scmp.lt.s32.totalorder %s176_s21, %s176_s21 }
  0x1f   :  { %v89_v19 = vpack.c.b8 %v81_v16, %v81_v16  ;;  %vm95_vm14 = vnez %v87_v15  ;;  %v102_v20 = vsel %vm94_vm12, 16843009, %v205_v10  ;;  %vm255_vm13 = vmand %vm43_vm2, %vm51_vm7  ;;  %vm68_vm7 = vcmp.ne.bf16.partialorder %v36_v8, 3212885888 }
  0x20   :  { %vm96_vm3 = vnez %v88_v17  ;;  %v103_v22 = vsel %vm95_vm14, 16843009, %v205_v10  ;;  %v110_v23 = vunpack.c.0.s8 %v102_v20  ;;  %vm261_vm6 = vmand %vm44_vm5, %vm52_vm10  ;;  %vm69_vm8 = vcmp.ne.bf16.partialorder %v37_v9, 3212885888  ;;  %p183_p11 = por %p182_p10, %p181_p9 }
  0x21   :  { %vm97_vm4 = vnez %v89_v19  ;;  %v104_v25 = vsel %vm96_vm3, 16843009, %v205_v10  ;;  %v111_v26 = vunpack.c.0.s8 %v103_v22  ;;  %vm61_vm2 = vmand %vm45_vm9, %vm53_vm0 }
  0x22   :  { %v105_v27 = vsel %vm97_vm4, 16843009, %v205_v10  ;;  %v112_v28 = vunpack.c.0.s8 %v104_v25  ;;  %vm74_vm12 = vmand %vm249_vm11, %vm66_vm15  ;;  %p184_p12 = pnand %p183_p11, %p177_p8 }
  0x23   :  { %v113_v29 = vunpack.c.0.s8 %v105_v27  ;;  %v118_v30 = vpack.c.b16 %v111_v26, %v110_v23  ;;  %vm75_vm5 = vmand %vm255_vm13, %vm67_vm1  ;;  %v82_v31 = vsel %vm74_vm12, 65537, %v205_v10 }
  0x24   :  { %vm76_vm10 = vmand %vm261_vm6, %vm68_vm7  ;;  %v83_v32 = vsel %vm75_vm5, 65537, %v205_v10  ;;  %v90_v33 = vpack.c.b8 %v82_v31, %v82_v31 }
  0x25   :  { %v119_v34 = vpack.c.b16 %v113_v29, %v112_v28  ;;  %vm77_vm9 = vmand %vm61_vm2, %vm69_vm8  ;;  %v84_v35 = vsel %vm76_vm10, 65537, %v205_v10  ;;  %v91_v36 = vpack.c.b8 %v83_v32, %v83_v32 }
  0x26   :  { %v85_v37 = vsel %vm77_vm9, 65537, %v205_v10  ;;  %v92_v38 = vpack.c.b8 %v84_v35, %v84_v35  ;;  %vm98_vm0 = vnez %v90_v33 }
  0x27   :  { %v120_v39 = vpack.c.b8 %v119_v34, %v118_v30  ;;  %v93_v40 = vpack.c.b8 %v85_v37, %v85_v37  ;;  %vm99_vm11 = vnez %v91_v36  ;;  %v106_v41 = vsel %vm98_vm0, 16843009, %v205_v10 }
  0x28   :  { %vm100_vm14 = vnez %v92_v38  ;;  %v107_v42 = vsel %vm99_vm11, 16843009, %v205_v10  ;;  %v114_v43 = vunpack.c.0.s8 %v106_v41 }
  0x29   :  { %vm124_vm13 = vnez %v120_v39  ;;  %vm101_vm15 = vnez %v93_v40  ;;  %v108_v44 = vsel %vm100_vm14, 16843009, %v205_v10  ;;  %v115_v45 = vunpack.c.0.s8 %v107_v42 }
  0x2a   :  { %v126_v46 = vsel %vm124_vm13, 16843009, %v205_v10  ;;  %v109_v47 = vsel %vm101_vm15, 16843009, %v205_v10  ;;  %v116_v48 = vunpack.c.0.s8 %v108_v44 }
  0x2b   :  { %128 = vst [vmem:[#allocation5] sm:$0xff] %v126_v46  ;;  %v117_v49 = vunpack.c.0.s8 %v109_v47  ;;  %v121_v50 = vpack.c.b16 %v115_v45, %v114_v43 }
  0x2d   :  { %v122_v51 = vpack.c.b16 %v117_v49, %v116_v48 }
  0x2f   :  { %v123_v52 = vpack.c.b8 %v122_v51, %v121_v50 }
  0x31   :  { %vm125_vm3 = vnez %v123_v52 }
  0x32   :  { %v127_v53 = vsel %vm125_vm3, 16843009, %v205_v10 }
  0x33   :  { %129 = vst [vmem:[#allocation5 + $0x8] sm:$0xff] %v127_v53 }
  0x34   :  { %187 = shalt.err (!%p184_p12)
}
  0x35   :  { %s188_s24 = scalar_lea.hbm %s298_s1, 256 }
  0x36   :  { %p189_p13 = scmp.ne.s32.totalorder %s298_s1, %s188_s24  ;;  %p192_p0 = scmp.lt.u32.totalorder %s188_s24, %s298_s1 }
  0x38   :  { %p194_p1 = pnand %p192_p0, %p189_p13 }
  0x3a   :  { %197 = shalt.err (!%p194_p1)
}
  0x3b   :  { %s207_s29 = smov 128   ;;  %s208_s30 = smov 8  }
  0x3c   :  { %141 = dma.vmem_to_hbm [thread:$0]  %s136_s20, 256, %s298_s1, [#allocation4], %s207_s29, %s207_s29, %s208_s30  }
  0x3d   :  { %200 = dma.done.wait [#allocation4], 256  }
  0x3e   :  { %201 = vsyncadd [#allocation4], 4294967040 }
  0x3f   :  { %145 = vsyncpa [#allocation3], 1 }
  0x40   :  { %146 = vsyncpa [#allocation4], 1 }

</bundles_post_ra>
